<compile_context>
chip_gen: v6e
topology: v6e:2x2x1
jax: 0.10.0
libtpu: 0.0.40
codegen_flags: <defaults>
</compile_context>

<pallas_src>
import functools

import jax
import jax.numpy as jnp
from jax.experimental import pallas as pl
from jax.experimental.pallas import tpu as pltpu


def combined_kernel(x_ref, wp_ref, bp_ref, w1_ref, b1_ref, w2_ref, b2_ref,
                    comb_ref, aug_ref, phy_ref):
    x = x_ref[...]

    # model_phy: single Linear.
    phy = jnp.dot(x, wp_ref[...], preferred_element_type=jnp.float32) + bp_ref[...]

    # model_aug: Linear -> tanh -> Linear (tanh runs on the EUP slot).
    h = jnp.tanh(
        jnp.dot(x, w1_ref[...], preferred_element_type=jnp.float32) + b1_ref[...]
    )
    aug = jnp.dot(h, w2_ref[...], preferred_element_type=jnp.float32) + b2_ref[...]

    # Three separate outputs: no lane concat, no sub-vreg slicing, no
    # post-kernel split of a packed slab.
    comb_ref[...] = (phy + aug).astype(comb_ref.dtype)
    aug_ref[...] = aug.astype(aug_ref.dtype)
    phy_ref[...] = phy.astype(phy_ref.dtype)


def _round_up(x, m):
    return ((x + m - 1) // m) * m


def _num_tensorcores():
    """Best-effort count of TensorCores per device (grid 'parallel' targets)."""
    try:
        kind = jax.devices()[0].device_kind.lower()
    except Exception:
        return 1
    # v4 (megacore) and v7x expose 2 TensorCores per device; v5e/v6e expose 1.
    if "v7" in kind or "v4" in kind:
        return 2
    return 1


def _pick_tile(batch, n_cores, tm_cap=1024):
    """Largest 8-row-aligned tile giving >= n_cores grid steps, capped at tm_cap."""
    b8 = _round_up(batch, 8)
    tm = _round_up(pl.cdiv(b8, n_cores), 8)
    tm = max(8, min(tm_cap, tm))
    grid = pl.cdiv(b8, tm)
    return tm, grid


def combined_forward(x, params):
    wp, bp, w1, b1, w2, b2 = params
    d_in, d_out = wp.shape
    hid = w1.shape[1]

    B = x.shape[0]
    n_cores = _num_tensorcores()
    tm, n_steps = _pick_tile(B, n_cores)
    b_pad = n_steps * tm
    if b_pad != B:
        x = jnp.pad(x, ((0, b_pad - B), (0, 0)))

    flops = 2 * b_pad * d_in * d_out + 2 * b_pad * d_in * hid \
        + 2 * b_pad * hid * d_out + 4 * b_pad * d_out
    bytes_accessed = 4 * (
        b_pad * d_in
        + d_in * d_out + d_out
        + d_in * hid + hid
        + hid * d_out + d_out
        + 3 * b_pad * d_out
    )

    out_sds = jax.ShapeDtypeStruct((b_pad, d_out), jnp.float32)
    row_spec = lambda shape: pl.BlockSpec(shape, lambda i: (i, 0))
    const_spec = lambda shape: pl.BlockSpec(shape, lambda i: (0, 0))

    combined, aug, phy = pl.pallas_call(
        combined_kernel,
        out_shape=(out_sds, out_sds, out_sds),
        grid_spec=pl.GridSpec(
            grid=(n_steps,),
            in_specs=[
                row_spec((tm, d_in)),        # x tile (double-buffered)
                const_spec((d_in, d_out)),   # wp (VMEM-resident)
                const_spec((1, d_out)),      # bp
                const_spec((d_in, hid)),     # w1
                const_spec((1, hid)),        # b1
                const_spec((hid, d_out)),    # w2
                const_spec((1, d_out)),      # b2
            ],
            out_specs=(
                row_spec((tm, d_out)),       # combined
                row_spec((tm, d_out)),       # aug
                row_spec((tm, d_out)),       # phy
            ),
        ),
        compiler_params=pltpu.CompilerParams(
            dimension_semantics=("parallel",),
        ),
        cost_estimate=pl.CostEstimate(
            flops=flops,
            transcendentals=b_pad * hid,
            bytes_accessed=bytes_accessed,
        ),
    )(x, wp, bp, w1, b1, w2, b2)

    if b_pad != B:
        combined, aug, phy = combined[:B], aug[:B], phy[:B]
    return combined, aug, phy


def init_params(key, d_in, hid, d_out):
    k0, k1, k2, k3, k4, k5 = jax.random.split(key, 6)
    wp = jax.random.normal(k0, (d_in, d_out), jnp.float32) * 0.1
    bp = jax.random.normal(k1, (1, d_out), jnp.float32) * 0.1
    w1 = jax.random.normal(k2, (d_in, hid), jnp.float32) * 0.1
    b1 = jax.random.normal(k3, (1, hid), jnp.float32) * 0.1
    w2 = jax.random.normal(k4, (hid, d_out), jnp.float32) * 0.1
    b2 = jax.random.normal(k5, (1, d_out), jnp.float32) * 0.1
    return (wp, bp, w1, b1, w2, b2)


def reference_forward(x, params):
    wp, bp, w1, b1, w2, b2 = params
    phy = x @ wp + bp
    aug = jnp.tanh(x @ w1 + b1) @ w2 + b2
    return phy + aug, aug, phy


if __name__ == "__main__":
    B, D_IN, HID, D_OUT = 256, 32, 64, 32

    key = jax.random.PRNGKey(0)
    kx, kp = jax.random.split(key)
    x = jax.random.normal(kx, (B, D_IN), jnp.float32)
    params = init_params(kp, D_IN, HID, D_OUT)

    combined, aug, phy = jax.block_until_ready(combined_forward(x, params))
    ref_c, ref_a, ref_p = reference_forward(x, params)

    assert combined.shape == (B, D_OUT)
    assert aug.shape == (B, D_OUT)
    assert phy.shape == (B, D_OUT)
    assert jnp.allclose(combined, ref_c, atol=1e-5)
    assert jnp.allclose(aug, ref_a, atol=1e-5)
    assert jnp.allclose(phy, ref_p, atol=1e-5)

    print("KERNEL_OK")
</pallas_src>

<mosaic_0001>
module attributes {stable_mosaic.version = 11 : i64} {
  func.func @combined_kernel(%arg0: i32, %arg1: memref<256x32xf32, #tpu.memory_space<vmem>>, %arg2: memref<32x32xf32, #tpu.memory_space<vmem>>, %arg3: memref<1x32xf32, #tpu.memory_space<vmem>>, %arg4: memref<32x64xf32, #tpu.memory_space<vmem>>, %arg5: memref<1x64xf32, #tpu.memory_space<vmem>>, %arg6: memref<64x32xf32, #tpu.memory_space<vmem>>, %arg7: memref<1x32xf32, #tpu.memory_space<vmem>>, %arg8: memref<256x32xf32, #tpu.memory_space<vmem>>, %arg9: memref<256x32xf32, #tpu.memory_space<vmem>>, %arg10: memref<256x32xf32, #tpu.memory_space<vmem>>) attributes {dimension_semantics = [#tpu.dimension_semantics<parallel>], iteration_bounds = array<i64: 1>, scalar_prefetch = 0 : i64, scratch_operands = 0 : i64, tpu.core_type = #tpu.core_type<tc>, window_params = [{transform_indices = @transform_0, window_bounds = array<i64: 256, 32>}, {pipeline_mode = #tpu.pipeline_mode<synchronous>, transform_indices = @transform_1, window_bounds = array<i64: 32, 32>}, {pipeline_mode = #tpu.pipeline_mode<synchronous>, transform_indices = @transform_2, window_bounds = array<i64: 1, 32>}, {pipeline_mode = #tpu.pipeline_mode<synchronous>, transform_indices = @transform_3, window_bounds = array<i64: 32, 64>}, {pipeline_mode = #tpu.pipeline_mode<synchronous>, transform_indices = @transform_4, window_bounds = array<i64: 1, 64>}, {pipeline_mode = #tpu.pipeline_mode<synchronous>, transform_indices = @transform_5, window_bounds = array<i64: 64, 32>}, {pipeline_mode = #tpu.pipeline_mode<synchronous>, transform_indices = @transform_6, window_bounds = array<i64: 1, 32>}, {transform_indices = @transform_7, window_bounds = array<i64: 256, 32>}, {transform_indices = @transform_8, window_bounds = array<i64: 256, 32>}, {transform_indices = @transform_9, window_bounds = array<i64: 256, 32>}]} {
    %c0 = arith.constant 0 : index
    %c0_0 = arith.constant 0 : index
    %0 = vector.load %arg1[%c0, %c0_0] : memref<256x32xf32, #tpu.memory_space<vmem>>, vector<256x32xf32>
    %c0_1 = arith.constant 0 : index
    %c0_2 = arith.constant 0 : index
    %1 = vector.load %arg2[%c0_1, %c0_2] : memref<32x32xf32, #tpu.memory_space<vmem>>, vector<32x32xf32>
    %cst = arith.constant dense<0.000000e+00> : vector<256x32xf32>
    %2 = tpu.matmul %0, %1, %cst {dimension_numbers = #tpu.dot_dimension_numbers<[1], [0], [0], [1], [0, 0, 1, 1], [], []>} : vector<256x32xf32>, vector<32x32xf32>, vector<256x32xf32> -> vector<256x32xf32>
    %c0_3 = arith.constant 0 : index
    %c0_4 = arith.constant 0 : index
    %3 = vector.load %arg3[%c0_3, %c0_4] : memref<1x32xf32, #tpu.memory_space<vmem>>, vector<1x32xf32>
    %4 = vector.broadcast %3 : vector<1x32xf32> to vector<256x32xf32>
    %5 = arith.addf %2, %4 : vector<256x32xf32>
    %c0_5 = arith.constant 0 : index
    %c0_6 = arith.constant 0 : index
    %6 = vector.load %arg4[%c0_5, %c0_6] : memref<32x64xf32, #tpu.memory_space<vmem>>, vector<32x64xf32>
    %cst_7 = arith.constant dense<0.000000e+00> : vector<256x64xf32>
    %7 = tpu.matmul %0, %6, %cst_7 {dimension_numbers = #tpu.dot_dimension_numbers<[1], [0], [0], [1], [0, 0, 1, 1], [], []>} : vector<256x32xf32>, vector<32x64xf32>, vector<256x64xf32> -> vector<256x64xf32>
    %c0_8 = arith.constant 0 : index
    %c0_9 = arith.constant 0 : index
    %8 = vector.load %arg5[%c0_8, %c0_9] : memref<1x64xf32, #tpu.memory_space<vmem>>, vector<1x64xf32>
    %9 = vector.broadcast %8 : vector<1x64xf32> to vector<256x64xf32>
    %10 = arith.addf %7, %9 : vector<256x64xf32>
    %11 = math.tanh %10 : vector<256x64xf32>
    %c0_10 = arith.constant 0 : index
    %c0_11 = arith.constant 0 : index
    %12 = vector.load %arg6[%c0_10, %c0_11] : memref<64x32xf32, #tpu.memory_space<vmem>>, vector<64x32xf32>
    %cst_12 = arith.constant dense<0.000000e+00> : vector<256x32xf32>
    %13 = tpu.matmul %11, %12, %cst_12 {dimension_numbers = #tpu.dot_dimension_numbers<[1], [0], [0], [1], [0, 0, 1, 1], [], []>} : vector<256x64xf32>, vector<64x32xf32>, vector<256x32xf32> -> vector<256x32xf32>
    %c0_13 = arith.constant 0 : index
    %c0_14 = arith.constant 0 : index
    %14 = vector.load %arg7[%c0_13, %c0_14] : memref<1x32xf32, #tpu.memory_space<vmem>>, vector<1x32xf32>
    %15 = vector.broadcast %14 : vector<1x32xf32> to vector<256x32xf32>
    %16 = arith.addf %13, %15 : vector<256x32xf32>
    %17 = arith.addf %5, %16 : vector<256x32xf32>
    %c0_15 = arith.constant 0 : index
    %c0_16 = arith.constant 0 : index
    %18 = vector.load %arg8[%c0_15, %c0_16] : memref<256x32xf32, #tpu.memory_space<vmem>>, vector<256x32xf32>
    tpu.vector_store %arg8[%c0_15, %c0_16], %17 {strides = array<i32>} : memref<256x32xf32, #tpu.memory_space<vmem>>, vector<256x32xf32>,
    %c0_17 = arith.constant 0 : index
    %c0_18 = arith.constant 0 : index
    %19 = vector.load %arg9[%c0_17, %c0_18] : memref<256x32xf32, #tpu.memory_space<vmem>>, vector<256x32xf32>
    tpu.vector_store %arg9[%c0_17, %c0_18], %16 {strides = array<i32>} : memref<256x32xf32, #tpu.memory_space<vmem>>, vector<256x32xf32>,
    %c0_19 = arith.constant 0 : index
    %c0_20 = arith.constant 0 : index
    %20 = vector.load %arg10[%c0_19, %c0_20] : memref<256x32xf32, #tpu.memory_space<vmem>>, vector<256x32xf32>
    tpu.vector_store %arg10[%c0_19, %c0_20], %5 {strides = array<i32>} : memref<256x32xf32, #tpu.memory_space<vmem>>, vector<256x32xf32>,
    return
  }
  func.func @transform_0(%arg0: i32) -> (i32, i32) {
    %c0_i32 = arith.constant 0 : i32
    %c0_i32_0 = arith.constant 0 : i32
    return %arg0, %c0_i32 : i32, i32
  }
  func.func @transform_1(%arg0: i32) -> (i32, i32) {
    %c0_i32 = arith.constant 0 : i32
    %c0_i32_0 = arith.constant 0 : i32
    %c0_i32_1 = arith.constant 0 : i32
    return %c0_i32, %c0_i32_0 : i32, i32
  }
  func.func @transform_2(%arg0: i32) -> (i32, i32) {
    %c0_i32 = arith.constant 0 : i32
    %c0_i32_0 = arith.constant 0 : i32
    %c0_i32_1 = arith.constant 0 : i32
    return %c0_i32, %c0_i32_0 : i32, i32
  }
  func.func @transform_3(%arg0: i32) -> (i32, i32) {
    %c0_i32 = arith.constant 0 : i32
    %c0_i32_0 = arith.constant 0 : i32
    %c0_i32_1 = arith.constant 0 : i32
    return %c0_i32, %c0_i32_0 : i32, i32
  }
  func.func @transform_4(%arg0: i32) -> (i32, i32) {
    %c0_i32 = arith.constant 0 : i32
    %c0_i32_0 = arith.constant 0 : i32
    %c0_i32_1 = arith.constant 0 : i32
    return %c0_i32, %c0_i32_0 : i32, i32
  }
  func.func @transform_5(%arg0: i32) -> (i32, i32) {
    %c0_i32 = arith.constant 0 : i32
    %c0_i32_0 = arith.constant 0 : i32
    %c0_i32_1 = arith.constant 0 : i32
    return %c0_i32, %c0_i32_0 : i32, i32
  }
  func.func @transform_6(%arg0: i32) -> (i32, i32) {
    %c0_i32 = arith.constant 0 : i32
    %c0_i32_0 = arith.constant 0 : i32
    %c0_i32_1 = arith.constant 0 : i32
    return %c0_i32, %c0_i32_0 : i32, i32
  }
  func.func @transform_7(%arg0: i32) -> (i32, i32) {
    %c0_i32 = arith.constant 0 : i32
    %c0_i32_0 = arith.constant 0 : i32
    return %arg0, %c0_i32 : i32, i32
  }
  func.func @transform_8(%arg0: i32) -> (i32, i32) {
    %c0_i32 = arith.constant 0 : i32
    %c0_i32_0 = arith.constant 0 : i32
    return %arg0, %c0_i32 : i32, i32
  }
  func.func @transform_9(%arg0: i32) -> (i32, i32) {
    %c0_i32 = arith.constant 0 : i32
    %c0_i32_0 = arith.constant 0 : i32
    return %arg0, %c0_i32 : i32, i32
  }
}

</mosaic_0001>

<bundles_post_ra>
// kernel: tpu_custom_call.1
= control target key start
LH: loop header
LB: loop body
LE: loop exit
PB: predicated region body
PF: predicated region fallthrough
CT: control target
= control target key end

     0   :  { %vm72_vm0 = vcmask 261120   ;;  %vm677_vm1 = vcmask 523264   ;;  %s2547_s1 = inlined_call_operand.vmem [shape: f32[32,32], index: 1, kind: input, shape index: {}]   ;;  %s2548_s0 = inlined_call_operand.vmem [shape: f32[256,32], index: 0, kind: input, shape index: {}]   ;;  %s2549_s3 = inlined_call_operand.vmem [shape: f32[32,64], index: 3, kind: input, shape index: {}]   ;;  %s2550_s5 = inlined_call_operand.vmem [shape: f32[64,32], index: 5, kind: input, shape index: {}]   ;;  %s2551_s2 = inlined_call_operand.vmem [shape: f32[1,32], index: 2, kind: input, shape index: {}]   ;;  %s2552_s9 = inlined_call_operand.vmem [shape: f32[256,32], index: 9, kind: output, shape index: {2}]   ;;  %s2553_s4 = inlined_call_operand.vmem [shape: f32[1,64], index: 4, kind: input, shape index: {}]   ;;  %s2554_s6 = inlined_call_operand.vmem [shape: f32[1,32], index: 6, kind: input, shape index: {}]   ;;  %s2555_s8 = inlined_call_operand.vmem [shape: f32[256,32], index: 8, kind: output, shape index: {1}]   ;;  %s2556_s7 = inlined_call_operand.vmem [shape: f32[256,32], index: 7, kind: output, shape index: {0}]  }
   0x1   :  { %v64_v0 = vld [vmem:[%s2547_s1 + $0x18] sm:$0xff]  ;;  %v63_v1 = vld [vmem:[%s2547_s1 + $0x10] sm:$0xff]  ;;  %v1657_v2 = vld [vmem:[%s2548_s0 + $0x80] sm:$0xff] }
   0x2   :  { %1526 = vmatprep.subr.mxu1 %v64_v0  ;;  %1350 = vmatprep.subr.mxu0 %v64_v0  ;;  %v62_v3 = vld [vmem:[%s2547_s1 + $0x8] sm:$0xff]  ;;  %v61_v4 = vld [vmem:[%s2547_s1] sm:$0xff]  ;;  %v397_v6 = vld [vmem:[%s2549_s3 + $0x18] sm:$0xff] }
   0x3   :  { %1530 = vmatpush3.msra.mxu1 %v64_v0  ;;  %1382 = vmatprep.mubr.msk.f32.mxu1 %vm72_vm0, %v1657_v2  ;;  %v1670_v5 = vld [vmem:[%s2548_s0 + $0x88] sm:$0xff]  ;;  %v1678_v7 = vld [vmem:[%s2548_s0 + $0x90] sm:$0xff]  ;;  %v1690_v9 = vld [vmem:[%s2548_s0 + $0x98] sm:$0xff] }
   0x4   :  { %1527 = vmatprep.subr.mxu1 %v63_v1  ;;  %1351 = vmatpush3.msra.mxu0 %v64_v0  ;;  %v396_v8 = vld [vmem:[%s2549_s3 + $0x10] sm:$0xff]  ;;  %v395_v10 = vld [vmem:[%s2549_s3 + $0x8] sm:$0xff]  ;;  %v1698_v11 = vld [vmem:[%s2548_s0 + $0xa0] sm:$0xff] }
   0x5   :  { %1531 = vmatpush3.msra.mxu1 %v63_v1  ;;  %1352 = vmatprep.subr.mxu0 %v63_v1  ;;  %v29_v12 = vld [vmem:[%s2548_s0] sm:$0xff]  ;;  %v1714_v14 = vld [vmem:[%s2548_s0 + $0xa8] sm:$0xff]  ;;  %v1722_v16 = vld [vmem:[%s2548_s0 + $0xb0] sm:$0xff] }
   0x6   :  { %1528 = vmatprep.subr.mxu1 %v62_v3  ;;  %1353 = vmatpush3.msra.mxu0 %v63_v1  ;;  %v394_v13 = vld [vmem:[%s2549_s3] sm:$0xff]  ;;  %v30_v15 = vld [vmem:[%s2548_s0 + $0x8] sm:$0xff]  ;;  %v31_v17 = vld [vmem:[%s2548_s0 + $0x10] sm:$0xff] }
   0x7   :  { %1532 = vmatpush3.msra.mxu1 %v62_v3  ;;  %1354 = vmatprep.subr.mxu0 %v62_v3  ;;  %v1736_v18 = vld [vmem:[%s2548_s0 + $0xb8] sm:$0xff]  ;;  %v1744_v20 = vld [vmem:[%s2548_s0 + $0xc0] sm:$0xff]  ;;  %v54_v22 = vld [vmem:[%s2548_s0 + $0xc8] sm:$0xff] }
   0x8   :  { %1529 = vmatprep.subr.mxu1 %v61_v4  ;;  %1355 = vmatpush3.msra.mxu0 %v62_v3  ;;  %v32_v19 = vld [vmem:[%s2548_s0 + $0x18] sm:$0xff]  ;;  %v33_v21 = vld [vmem:[%s2548_s0 + $0x20] sm:$0xff]  ;;  %v34_v23 = vld [vmem:[%s2548_s0 + $0x28] sm:$0xff] }
   0x9   :  { %1533 = vmatpush3.msra.mxu1 %v61_v4  ;;  %1356 = vmatprep.subr.mxu0 %v61_v4  ;;  %v55_v24 = vld [vmem:[%s2548_s0 + $0xd0] sm:$0xff]  ;;  %v56_v26 = vld [vmem:[%s2548_s0 + $0xd8] sm:$0xff]  ;;  %v57_v28 = vld [vmem:[%s2548_s0 + $0xe0] sm:$0xff] }
   0xa   :  { %1383 = vmatmul.mubr.msk.f32.vlgmr.msra.gmra.mxu1 %vm72_vm0, %v1670_v5  ;;  %1406 = vmatprep.subr.mxu1 %v397_v6  ;;  %v35_v25 = vld [vmem:[%s2548_s0 + $0x30] sm:$0xff]  ;;  %v36_v27 = vld [vmem:[%s2548_s0 + $0x38] sm:$0xff]  ;;  %v37_v29 = vld [vmem:[%s2548_s0 + $0x40] sm:$0xff] }
   0xb   :  { %1407 = vmatpush3.msra.mxu1 %v397_v6  ;;  %1385 = vmatprep.mubr.msk.f32.mxu1 %vm72_vm0, %v1678_v7  ;;  %v58_v30 = vld [vmem:[%s2548_s0 + $0xe8] sm:$0xff]  ;;  %v59_v32 = vld [vmem:[%s2548_s0 + $0xf0] sm:$0xff]  ;;  %v60_v34 = vld [vmem:[%s2548_s0 + $0xf8] sm:$0xff] }
   0xc   :  { %1408 = vmatprep.subr.mxu1 %v396_v8  ;;  %1357 = vmatpush3.msra.mxu0 %v61_v4  ;;  %v38_v31 = vld [vmem:[%s2548_s0 + $0x48] sm:$0xff]  ;;  %v39_v33 = vld [vmem:[%s2548_s0 + $0x50] sm:$0xff]  ;;  %v40_v35 = vld [vmem:[%s2548_s0 + $0x58] sm:$0xff] }
   0xd   :  { %1409 = vmatpush3.msra.mxu1 %v396_v8  ;;  %1358 = vmatprep.mubr.msk.f32.mxu0 %vm72_vm0, %v29_v12  ;;  %v41_v36 = vld [vmem:[%s2548_s0 + $0x60] sm:$0xff]  ;;  %v42_v37 = vld [vmem:[%s2548_s0 + $0x68] sm:$0xff]  ;;  %v43_v38 = vld [vmem:[%s2548_s0 + $0x70] sm:$0xff] }
   0xe   :  { %1386 = vmatmul.mubr.msk.f32.gmra.mxu1 %vm72_vm0, %v1690_v9  ;;  %1410 = vmatprep.subr.mxu1 %v395_v10  ;;  %v44_v39 = vld [vmem:[%s2548_s0 + $0x78] sm:$0xff]  ;;  %v668_v41 = vld [vmem:[%s2550_s5 + $0x30] sm:$0xff]  ;;  %v667_v42 = vld [vmem:[%s2550_s5 + $0x28] sm:$0xff] }
   0xf   :  { %1388 = vmatprep.mubr.msk.f32.mxu1 %vm72_vm0, %v1698_v11  ;;  %1411 = vmatpush3.msra.mxu1 %v395_v10  ;;  %v669_v40 = vld [vmem:[%s2550_s5 + $0x38] sm:$0xff]  ;;  %v666_v43 = vld [vmem:[%s2550_s5 + $0x20] sm:$0xff]  ;;  %v664_v45 = vld [vmem:[%s2550_s5 + $0x10] sm:$0xff] }
  0x10   :  { %1412 = vmatprep.subr.mxu1 %v394_v13  ;;  %1359 = vmatmul.mubr.msk.f32.vlgmr.msra.gmra.mxu0 %vm72_vm0, %v30_v15  ;;  %v665_v44 = vld [vmem:[%s2550_s5 + $0x18] sm:$0xff]  ;;  %v663_v46 = vld [vmem:[%s2550_s5 + $0x8] sm:$0xff]  ;;  %v662_v47 = vld [vmem:[%s2550_s5] sm:$0xff] }
  0x11   :  { %1413 = vmatpush3.msra.mxu1 %v394_v13  ;;  %1361 = vmatprep.mubr.msk.f32.mxu0 %vm72_vm0, %v31_v17  ;;  %v1895_v48 = vld [vmem:[%s2551_s2] ss:$0 sm:$0xff] }
  0x12   :  { %1389 = vmatmul.mubr.msk.f32.gmra.mxu1 %vm72_vm0, %v1714_v14  ;;  %1462 = vmatprep.subr.mxu0 %v669_v40 }
  0x13   :  { %1391 = vmatprep.mubr.msk.f32.mxu1 %vm72_vm0, %v1722_v16  ;;  %1463 = vmatpush3.msra.mxu0 %v669_v40 }
  0x14   :  { %1362 = vmatmul.mubr.msk.f32.gmra.mxu0 %vm72_vm0, %v32_v19  ;;  %1464 = vmatprep.subr.mxu0 %v668_v41 }
  0x15   :  { %1364 = vmatprep.mubr.msk.f32.mxu0 %vm72_vm0, %v33_v21  ;;  %1465 = vmatpush3.msra.mxu0 %v668_v41 }
  0x16   :  { %1392 = vmatmul.mubr.msk.f32.gmra.mxu1 %vm72_vm0, %v1736_v18  ;;  %1466 = vmatprep.subr.mxu0 %v667_v42 }
  0x17   :  { %1394 = vmatprep.mubr.msk.f32.mxu1 %vm72_vm0, %v1744_v20  ;;  %1467 = vmatpush3.msra.mxu0 %v667_v42  ;;  %v2114_v42 = vld [vmem:[%s2553_s4] ss:$0 sm:$0xff] }
  0x18   :  { %1365 = vmatmul.mubr.msk.f32.gmra.mxu0 %vm72_vm0, %v34_v23  ;;  %1468 = vmatprep.subr.mxu0 %v666_v43 }
  0x19   :  { %1367 = vmatprep.mubr.msk.f32.mxu0 %vm72_vm0, %v35_v25  ;;  %1469 = vmatpush3.msra.mxu0 %v666_v43 }
  0x1a   :  { %1395 = vmatmul.mubr.msk.f32.gmra.mxu1 %vm72_vm0, %v54_v22  ;;  %1470 = vmatprep.subr.mxu0 %v665_v44 }
  0x1b   :  { %1397 = vmatprep.mubr.msk.f32.mxu1 %vm72_vm0, %v55_v24  ;;  %1471 = vmatpush3.msra.mxu0 %v665_v44 }
  0x1c   :  { %1368 = vmatmul.mubr.msk.f32.gmra.mxu0 %vm72_vm0, %v36_v27  ;;  %1472 = vmatprep.subr.mxu0 %v664_v45 }
  0x1d   :  { %1370 = vmatprep.mubr.msk.f32.mxu0 %vm72_vm0, %v37_v29  ;;  %1473 = vmatpush3.msra.mxu0 %v664_v45 }
  0x1e   :  { %1398 = vmatmul.mubr.msk.f32.gmra.mxu1 %vm72_vm0, %v56_v26  ;;  %1474 = vmatprep.subr.mxu0 %v663_v46 }
  0x1f   :  { %1400 = vmatprep.mubr.msk.f32.mxu1 %vm72_vm0, %v57_v28  ;;  %1475 = vmatpush3.msra.mxu0 %v663_v46 }
  0x20   :  { %1371 = vmatmul.mubr.msk.f32.gmra.mxu0 %vm72_vm0, %v38_v31  ;;  %1476 = vmatprep.subr.mxu0 %v662_v47 }
  0x21   :  { %1373 = vmatprep.mubr.msk.f32.mxu0 %vm72_vm0, %v39_v33  ;;  %1477 = vmatpush3.msra.mxu0 %v662_v47 }
  0x22   :  { %1401 = vmatmul.mubr.msk.f32.gmra.mxu1 %vm72_vm0, %v58_v30 }
  0x23   :  { %1403 = vmatprep.mubr.msk.f32.mxu1 %vm72_vm0, %v59_v32 }
  0x24   :  { %1374 = vmatmul.mubr.msk.f32.gmra.mxu0 %vm72_vm0, %v40_v35 }
  0x25   :  { %1376 = vmatprep.mubr.msk.f32.mxu0 %vm72_vm0, %v41_v36 }
  0x26   :  { %1404 = vmatmul.mubr.msk.f32.gmra.mxu1 %vm72_vm0, %v60_v34 }
  0x27   :  { %1414 = vmatprep.mubr.msk.f32.mxu1 %vm72_vm0, %v29_v12 }
  0x28   :  { %1377 = vmatmul.mubr.msk.f32.gmra.mxu0 %vm72_vm0, %v42_v37 }
  0x29   :  { %1379 = vmatprep.mubr.msk.f32.mxu0 %vm72_vm0, %v43_v38 }
  0x2a   :  { %1415 = vmatmul.mubr.msk.f32.vlgmr.msra.gmra.mxu1 %vm72_vm0, %v30_v15 }
  0x2b   :  { %1417 = vmatprep.mubr.msk.f32.mxu1 %vm72_vm0, %v31_v17 }
  0x2c   :  { %1380 = vmatmul.mubr.msk.f32.gmra.mxu0 %vm72_vm0, %v44_v39 }
  0x2e   :  { %1418 = vmatmul.mubr.msk.f32.gmra.mxu1 %vm72_vm0, %v32_v19 }
  0x2f   :  { %1420 = vmatprep.mubr.msk.f32.mxu1 %vm72_vm0, %v33_v21 }
  0x32   :  { %1421 = vmatmul.mubr.msk.f32.gmra.mxu1 %vm72_vm0, %v34_v23 }
  0x33   :  { %1423 = vmatprep.mubr.msk.f32.mxu1 %vm72_vm0, %v35_v25 }
  0x36   :  { %1424 = vmatmul.mubr.msk.f32.gmra.mxu1 %vm72_vm0, %v36_v27 }
  0x37   :  { %1426 = vmatprep.mubr.msk.f32.mxu1 %vm72_vm0, %v37_v29 }
  0x3a   :  { %1427 = vmatmul.mubr.msk.f32.gmra.mxu1 %vm72_vm0, %v38_v31 }
  0x3b   :  { %1429 = vmatprep.mubr.msk.f32.mxu1 %vm72_vm0, %v39_v33 }
  0x3e   :  { %1430 = vmatmul.mubr.msk.f32.gmra.mxu1 %vm72_vm0, %v40_v35 }
  0x3f   :  { %1432 = vmatprep.mubr.msk.f32.mxu1 %vm72_vm0, %v41_v36 }
  0x42   :  { %1433 = vmatmul.mubr.msk.f32.gmra.mxu1 %vm72_vm0, %v42_v37 }
  0x43   :  { %1435 = vmatprep.mubr.msk.f32.mxu1 %vm72_vm0, %v43_v38 }
  0x46   :  { %1436 = vmatmul.mubr.msk.f32.gmra.mxu1 %vm72_vm0, %v44_v39 }
  0x47   :  { %1438 = vmatprep.mubr.msk.f32.mxu1 %vm72_vm0, %v1657_v2 }
  0x4a   :  { %1439 = vmatmul.mubr.msk.f32.gmra.mxu1 %vm72_vm0, %v1670_v5 }
  0x4b   :  { %1441 = vmatprep.mubr.msk.f32.mxu1 %vm72_vm0, %v1678_v7 }
  0x4e   :  { %1442 = vmatmul.mubr.msk.f32.gmra.mxu1 %vm72_vm0, %v1690_v9 }
  0x4f   :  { %1444 = vmatprep.mubr.msk.f32.mxu1 %vm72_vm0, %v1698_v11 }
  0x52   :  { %1445 = vmatmul.mubr.msk.f32.gmra.mxu1 %vm72_vm0, %v1714_v14 }
  0x53   :  { %1447 = vmatprep.mubr.msk.f32.mxu1 %vm72_vm0, %v1722_v16 }
  0x56   :  { %1448 = vmatmul.mubr.msk.f32.gmra.mxu1 %vm72_vm0, %v1736_v18 }
  0x57   :  { %1450 = vmatprep.mubr.msk.f32.mxu1 %vm72_vm0, %v1744_v20 }
  0x5a   :  { %1451 = vmatmul.mubr.msk.f32.gmra.mxu1 %vm72_vm0, %v54_v22 }
  0x5b   :  { %1453 = vmatprep.mubr.msk.f32.mxu1 %vm72_vm0, %v55_v24 }
  0x5e   :  { %1454 = vmatmul.mubr.msk.f32.gmra.mxu1 %vm72_vm0, %v56_v26 }
  0x5f   :  { %1456 = vmatprep.mubr.msk.f32.mxu1 %vm72_vm0, %v57_v28 }
  0x62   :  { %1457 = vmatmul.mubr.msk.f32.gmra.mxu1 %vm72_vm0, %v58_v30 }
  0x63   :  { %1459 = vmatprep.mubr.msk.f32.mxu1 %vm72_vm0, %v59_v32 }
  0x66   :  { %1460 = vmatmul.mubr.msk.f32.gmra.mxu1 %vm72_vm0, %v60_v34 }
  0xca   :  { %v1384_v49 = vpop.f32.mrf.mxu1 }
  0xcb   :  { %v1898_v50 = vadd.f32 %v1384_v49, %v1895_v48 }
  0xcc   :  { %v315_v51 = vpop.f32.mrf.mxu1 }
  0xcd   :  { %1112 = vst.msk [vmem:[%s2552_s9 + $0x88] sm:$0xff] %vm72_vm0, %v1898_v50  ;;  %v1906_v52 = vadd.f32 %v1895_v48, %v315_v51 }
  0xce   :  { %v1387_v53 = vpop.f32.mrf.mxu1 }
  0xcf   :  { %1111 = vst.msk [vmem:[%s2552_s9 + $0x80] sm:$0xff] %vm72_vm0, %v1906_v52  ;;  %v1914_v54 = vadd.f32 %v1387_v53, %v1895_v48 }
  0xd0   :  { %v325_v55 = vpop.f32.mrf.mxu1  ;;  %v1360_v56 = vpop.f32.mrf.mxu0 }
  0xd1   :  { %1114 = vst.msk [vmem:[%s2552_s9 + $0x98] sm:$0xff] %vm72_vm0, %v1914_v54  ;;  %v1922_v57 = vadd.f32 %v1895_v48, %v325_v55  ;;  %v1925_v58 = vadd.f32 %v1360_v56, %v1895_v48 }
  0xd2   :  { %v1390_v59 = vpop.f32.mrf.mxu1  ;;  %v235_v60 = vpop.f32.mrf.mxu0 }
  0xd3   :  { %1113 = vst.msk [vmem:[%s2552_s9 + $0x90] sm:$0xff] %vm72_vm0, %v1922_v57  ;;  %v1933_v61 = vadd.f32 %v1390_v59, %v1895_v48  ;;  %1096 = vst.msk [vmem:[%s2552_s9 + $0x8] sm:$0xff] %vm72_vm0, %v1925_v58  ;;  %v1941_v62 = vadd.f32 %v1895_v48, %v235_v60 }
  0xd4   :  { %v335_v63 = vpop.f32.mrf.mxu1  ;;  %v1363_v0 = vpop.f32.mrf.mxu0 }
  0xd5   :  { %1116 = vst.msk [vmem:[%s2552_s9 + $0xa8] sm:$0xff] %vm72_vm0, %v1933_v61  ;;  %v1949_v1 = vadd.f32 %v1895_v48, %v335_v63  ;;  %1095 = vst.msk [vmem:[%s2552_s9] sm:$0xff] %vm72_vm0, %v1941_v62  ;;  %v1957_v2 = vadd.f32 %v1363_v0, %v1895_v48 }
  0xd6   :  { %v1393_v3 = vpop.f32.mrf.mxu1  ;;  %v245_v4 = vpop.f32.mrf.mxu0 }
  0xd7   :  { %1115 = vst.msk [vmem:[%s2552_s9 + $0xa0] sm:$0xff] %vm72_vm0, %v1949_v1  ;;  %v1965_v5 = vadd.f32 %v1393_v3, %v1895_v48  ;;  %1098 = vst.msk [vmem:[%s2552_s9 + $0x18] sm:$0xff] %vm72_vm0, %v1957_v2  ;;  %v1973_v6 = vadd.f32 %v1895_v48, %v245_v4 }
  0xd8   :  { %v345_v7 = vpop.f32.mrf.mxu1  ;;  %v1366_v8 = vpop.f32.mrf.mxu0 }
  0xd9   :  { %1118 = vst.msk [vmem:[%s2552_s9 + $0xb8] sm:$0xff] %vm72_vm0, %v1965_v5  ;;  %v1981_v9 = vadd.f32 %v1895_v48, %v345_v7  ;;  %1097 = vst.msk [vmem:[%s2552_s9 + $0x10] sm:$0xff] %vm72_vm0, %v1973_v6  ;;  %v1989_v10 = vadd.f32 %v1366_v8, %v1895_v48 }
  0xda   :  { %v1396_v11 = vpop.f32.mrf.mxu1  ;;  %v255_v12 = vpop.f32.mrf.mxu0 }
  0xdb   :  { %1117 = vst.msk [vmem:[%s2552_s9 + $0xb0] sm:$0xff] %vm72_vm0, %v1981_v9  ;;  %v1997_v13 = vadd.f32 %v1396_v11, %v1895_v48  ;;  %1100 = vst.msk [vmem:[%s2552_s9 + $0x28] sm:$0xff] %vm72_vm0, %v1989_v10  ;;  %v2005_v14 = vadd.f32 %v1895_v48, %v255_v12 }
  0xdc   :  { %v355_v15 = vpop.f32.mrf.mxu1  ;;  %v1369_v16 = vpop.f32.mrf.mxu0 }
  0xdd   :  { %1120 = vst.msk [vmem:[%s2552_s9 + $0xc8] sm:$0xff] %vm72_vm0, %v1997_v13  ;;  %v2013_v17 = vadd.f32 %v1895_v48, %v355_v15  ;;  %1099 = vst.msk [vmem:[%s2552_s9 + $0x20] sm:$0xff] %vm72_vm0, %v2005_v14  ;;  %v2021_v18 = vadd.f32 %v1369_v16, %v1895_v48 }
  0xde   :  { %v1399_v19 = vpop.f32.mrf.mxu1  ;;  %v265_v20 = vpop.f32.mrf.mxu0 }
  0xdf   :  { %1119 = vst.msk [vmem:[%s2552_s9 + $0xc0] sm:$0xff] %vm72_vm0, %v2013_v17  ;;  %v2029_v21 = vadd.f32 %v1399_v19, %v1895_v48  ;;  %1102 = vst.msk [vmem:[%s2552_s9 + $0x38] sm:$0xff] %vm72_vm0, %v2021_v18  ;;  %v2037_v22 = vadd.f32 %v1895_v48, %v265_v20 }
  0xe0   :  { %v365_v23 = vpop.f32.mrf.mxu1  ;;  %v1372_v24 = vpop.f32.mrf.mxu0 }
  0xe1   :  { %1122 = vst.msk [vmem:[%s2552_s9 + $0xd8] sm:$0xff] %vm72_vm0, %v2029_v21  ;;  %v2045_v25 = vadd.f32 %v1895_v48, %v365_v23  ;;  %1101 = vst.msk [vmem:[%s2552_s9 + $0x30] sm:$0xff] %vm72_vm0, %v2037_v22  ;;  %v2053_v26 = vadd.f32 %v1372_v24, %v1895_v48 }
  0xe2   :  { %v1402_v27 = vpop.f32.mrf.mxu1  ;;  %v275_v28 = vpop.f32.mrf.mxu0 }
  0xe3   :  { %1121 = vst.msk [vmem:[%s2552_s9 + $0xd0] sm:$0xff] %vm72_vm0, %v2045_v25  ;;  %v2061_v29 = vadd.f32 %v1402_v27, %v1895_v48  ;;  %1104 = vst.msk [vmem:[%s2552_s9 + $0x48] sm:$0xff] %vm72_vm0, %v2053_v26  ;;  %v2069_v30 = vadd.f32 %v1895_v48, %v275_v28 }
  0xe4   :  { %v375_v31 = vpop.f32.mrf.mxu1  ;;  %v1375_v32 = vpop.f32.mrf.mxu0 }
  0xe5   :  { %1124 = vst.msk [vmem:[%s2552_s9 + $0xe8] sm:$0xff] %vm72_vm0, %v2061_v29  ;;  %v2077_v33 = vadd.f32 %v1895_v48, %v375_v31  ;;  %1103 = vst.msk [vmem:[%s2552_s9 + $0x40] sm:$0xff] %vm72_vm0, %v2069_v30  ;;  %v2085_v34 = vadd.f32 %v1375_v32, %v1895_v48 }
  0xe6   :  { %v1405_v35 = vpop.f32.mrf.mxu1  ;;  %v285_v36 = vpop.f32.mrf.mxu0 }
  0xe7   :  { %1123 = vst.msk [vmem:[%s2552_s9 + $0xe0] sm:$0xff] %vm72_vm0, %v2077_v33  ;;  %v2093_v37 = vadd.f32 %v1405_v35, %v1895_v48  ;;  %1106 = vst.msk [vmem:[%s2552_s9 + $0x58] sm:$0xff] %vm72_vm0, %v2085_v34  ;;  %v2101_v38 = vadd.f32 %v1895_v48, %v285_v36 }
  0xe8   :  { %v385_v39 = vpop.f32.mrf.mxu1  ;;  %v1378_v40 = vpop.f32.mrf.mxu0 }
  0xe9   :  { %1126 = vst.msk [vmem:[%s2552_s9 + $0xf8] sm:$0xff] %vm72_vm0, %v2093_v37  ;;  %v2109_v41 = vadd.f32 %v1895_v48, %v385_v39  ;;  %1105 = vst.msk [vmem:[%s2552_s9 + $0x50] sm:$0xff] %vm72_vm0, %v2101_v38  ;;  %v2122_v43 = vadd.f32 %v1378_v40, %v1895_v48 }
  0xea   :  { %v1416_v44 = vpop.f32.mrf.mxu1  ;;  %v295_v45 = vpop.f32.mrf.mxu0 }
  0xeb   :  { %1125 = vst.msk [vmem:[%s2552_s9 + $0xf0] sm:$0xff] %vm72_vm0, %v2109_v41  ;;  %1108 = vst.msk [vmem:[%s2552_s9 + $0x68] sm:$0xff] %vm72_vm0, %v2122_v43  ;;  %v2135_v46 = vadd.f32 %v1895_v48, %v295_v45  ;;  %v477_v47 = vadd.f32 %v1416_v44, %v2114_v42 }
  0xec   :  { %v471_v49 = vpop.f32.mrf.mxu1  ;;  %v1381_v51 = vpop.f32.mrf.mxu0 }
  0xed   :  { %v472_v53 = vadd.f32 %v2114_v42, %v471_v49  ;;  %1107 = vst.msk [vmem:[%s2552_s9 + $0x60] sm:$0xff] %vm72_vm0, %v2135_v46  ;;  %v2145_v55 = vadd.f32 %v1381_v51, %v1895_v48 }
  0xee   :  { %v1419_v56 = vpop.f32.mrf.mxu1  ;;  %v305_v59 = vpop.f32.mrf.mxu0 }
  0xef   :  { %1534 = vtanh.f32 %v472_v53  ;;  %1110 = vst.msk [vmem:[%s2552_s9 + $0x78] sm:$0xff] %vm72_vm0, %v2145_v55  ;;  %v2153_v60 = vadd.f32 %v1895_v48, %v305_v59  ;;  %v487_v63 = vadd.f32 %v1419_v56, %v2114_v42 }
  0xf0   :  { %1536 = vtanh.f32 %v477_v47  ;;  %v481_v0 = vpop.f32.mrf.mxu1 }
  0xf1   :  { %v482_v3 = vadd.f32 %v2114_v42, %v481_v0  ;;  %1109 = vst.msk [vmem:[%s2552_s9 + $0x70] sm:$0xff] %vm72_vm0, %v2153_v60 }
  0xf2   :  { %v1422_v4 = vpop.f32.mrf.mxu1 }
  0xf3   :  { %1538 = vtanh.f32 %v482_v3  ;;  %v497_v7 = vadd.f32 %v1422_v4, %v2114_v42 }
  0xf4   :  { %1540 = vtanh.f32 %v487_v63  ;;  %v491_v8 = vpop.f32.mrf.mxu1 }
  0xf5   :  { %v492_v48 = vadd.f32 %v2114_v42, %v491_v8 }
  0xf6   :  { %v1425_v11 = vpop.f32.mrf.mxu1 }
  0xf7   :  { %1542 = vtanh.f32 %v492_v48  ;;  %v507_v12 = vadd.f32 %v1425_v11, %v2114_v42 }
  0xf8   :  { %1544 = vtanh.f32 %v497_v7  ;;  %v501_v15 = vpop.f32.mrf.mxu1 }
  0xf9   :  { %v502_v16 = vadd.f32 %v2114_v42, %v501_v15 }
  0xfa   :  { %v1428_v19 = vpop.f32.mrf.mxu1 }
  0xfb   :  { %1546 = vtanh.f32 %v502_v16  ;;  %v517_v23 = vadd.f32 %v1428_v19, %v2114_v42 }
  0xfc   :  { %v1535_v20 = vpop.eup %1534  ;;  %1548 = vtanh.f32 %v507_v12  ;;  %v511_v24 = vpop.f32.mrf.mxu1 }
  0xfd   :  { %v1537_v27 = vpop.eup %1536  ;;  %v512_v28 = vadd.f32 %v2114_v42, %v511_v24  ;;  %1478 = vmatprep.mubr.msk.f32.mxu0 %vm677_vm1, %v1535_v20 }
  0xfe   :  { %v1431_v31 = vpop.f32.mrf.mxu1  ;;  %1479 = vmatmul.mubr.msk.f32.vlgmr.msra.gmra.mxu0 %vm677_vm1, %v1537_v27 }
  0xff   :  { %1550 = vtanh.f32 %v512_v28  ;;  %v527_v35 = vadd.f32 %v1431_v31, %v2114_v42 }
 0x100   :  { %v1539_v32 = vpop.eup %1538  ;;  %1552 = vtanh.f32 %v517_v23  ;;  %v521_v36 = vpop.f32.mrf.mxu1 }
 0x101   :  { %v1541_v39 = vpop.eup %1540  ;;  %v522_v40 = vadd.f32 %v2114_v42, %v521_v36  ;;  %1481 = vmatprep.mubr.msk.f32.mxu0 %vm677_vm1, %v1539_v32 }
 0x102   :  { %v1434_v44 = vpop.f32.mrf.mxu1  ;;  %1482 = vmatmul.mubr.msk.f32.gmra.mxu0 %vm677_vm1, %v1541_v39 }
 0x103   :  { %1554 = vtanh.f32 %v522_v40  ;;  %v537_v47 = vadd.f32 %v1434_v44, %v2114_v42 }
 0x104   :  { %v1543_v45 = vpop.eup %1542  ;;  %1556 = vtanh.f32 %v527_v35  ;;  %v531_v49 = vpop.f32.mrf.mxu1 }
 0x105   :  { %v1545_v51 = vpop.eup %1544  ;;  %v532_v53 = vadd.f32 %v2114_v42, %v531_v49  ;;  %1484 = vmatprep.mubr.msk.f32.mxu0 %vm677_vm1, %v1543_v45 }
 0x106   :  { %v1437_v56 = vpop.f32.mrf.mxu1  ;;  %1485 = vmatmul.mubr.msk.f32.gmra.mxu0 %vm677_vm1, %v1545_v51 }
 0x107   :  { %1558 = vtanh.f32 %v532_v53  ;;  %v547_v63 = vadd.f32 %v1437_v56, %v2114_v42 }
 0x108   :  { %v1547_v59 = vpop.eup %1546  ;;  %1560 = vtanh.f32 %v537_v47  ;;  %v541_v0 = vpop.f32.mrf.mxu1 }
 0x109   :  { %v1549_v3 = vpop.eup %1548  ;;  %v542_v4 = vadd.f32 %v2114_v42, %v541_v0  ;;  %1487 = vmatprep.mubr.msk.f32.mxu0 %vm677_vm1, %v1547_v59 }
 0x10a   :  { %v1440_v7 = vpop.f32.mrf.mxu1  ;;  %1488 = vmatmul.mubr.msk.f32.gmra.mxu0 %vm677_vm1, %v1549_v3 }
 0x10b   :  { %1562 = vtanh.f32 %v542_v4  ;;  %v557_v48 = vadd.f32 %v1440_v7, %v2114_v42 }
 0x10c   :  { %v1551_v8 = vpop.eup %1550  ;;  %1564 = vtanh.f32 %v547_v63  ;;  %v551_v11 = vpop.f32.mrf.mxu1 }
 0x10d   :  { %v1553_v12 = vpop.eup %1552  ;;  %v552_v15 = vadd.f32 %v2114_v42, %v551_v11  ;;  %1490 = vmatprep.mubr.msk.f32.mxu0 %vm677_vm1, %v1551_v8 }
 0x10e   :  { %v1443_v16 = vpop.f32.mrf.mxu1  ;;  %1491 = vmatmul.mubr.msk.f32.gmra.mxu0 %vm677_vm1, %v1553_v12 }
 0x10f   :  { %1566 = vtanh.f32 %v552_v15  ;;  %v567_v20 = vadd.f32 %v1443_v16, %v2114_v42 }
 0x110   :  { %v1555_v19 = vpop.eup %1554  ;;  %1568 = vtanh.f32 %v557_v48  ;;  %v561_v23 = vpop.f32.mrf.mxu1 }
 0x111   :  { %v1557_v24 = vpop.eup %1556  ;;  %v562_v27 = vadd.f32 %v2114_v42, %v561_v23  ;;  %1493 = vmatprep.mubr.msk.f32.mxu0 %vm677_vm1, %v1555_v19 }
 0x112   :  { %v1446_v28 = vpop.f32.mrf.mxu1  ;;  %1494 = vmatmul.mubr.msk.f32.gmra.mxu0 %vm677_vm1, %v1557_v24 }
 0x113   :  { %1570 = vtanh.f32 %v562_v27  ;;  %v577_v32 = vadd.f32 %v1446_v28, %v2114_v42 }
 0x114   :  { %v1559_v31 = vpop.eup %1558  ;;  %1572 = vtanh.f32 %v567_v20  ;;  %v571_v35 = vpop.f32.mrf.mxu1 }
 0x115   :  { %v1561_v36 = vpop.eup %1560  ;;  %v572_v39 = vadd.f32 %v2114_v42, %v571_v35  ;;  %1496 = vmatprep.mubr.msk.f32.mxu0 %vm677_vm1, %v1559_v31 }
 0x116   :  { %v1449_v40 = vpop.f32.mrf.mxu1  ;;  %1497 = vmatmul.mubr.msk.f32.gmra.mxu0 %vm677_vm1, %v1561_v36 }
 0x117   :  { %1574 = vtanh.f32 %v572_v39  ;;  %v587_v45 = vadd.f32 %v1449_v40, %v2114_v42 }
 0x118   :  { %v1563_v44 = vpop.eup %1562  ;;  %1576 = vtanh.f32 %v577_v32  ;;  %v581_v47 = vpop.f32.mrf.mxu1 }
 0x119   :  { %v1565_v49 = vpop.eup %1564  ;;  %v582_v51 = vadd.f32 %v2114_v42, %v581_v47  ;;  %1499 = vmatprep.mubr.msk.f32.mxu0 %vm677_vm1, %v1563_v44 }
 0x11a   :  { %v1452_v53 = vpop.f32.mrf.mxu1  ;;  %1500 = vmatmul.mubr.msk.f32.gmra.mxu0 %vm677_vm1, %v1565_v49 }
 0x11b   :  { %1578 = vtanh.f32 %v582_v51  ;;  %v597_v59 = vadd.f32 %v1452_v53, %v2114_v42  ;;  %v2225_v53 = vld [vmem:[%s2554_s6] ss:$0 sm:$0xff] }
 0x11c   :  { %v1567_v56 = vpop.eup %1566  ;;  %1580 = vtanh.f32 %v587_v45  ;;  %v591_v63 = vpop.f32.mrf.mxu1 }
 0x11d   :  { %v1569_v0 = vpop.eup %1568  ;;  %v592_v3 = vadd.f32 %v2114_v42, %v591_v63  ;;  %1502 = vmatprep.mubr.msk.f32.mxu0 %vm677_vm1, %v1567_v56 }
 0x11e   :  { %v1455_v4 = vpop.f32.mrf.mxu1  ;;  %1503 = vmatmul.mubr.msk.f32.gmra.mxu0 %vm677_vm1, %v1569_v0 }
 0x11f   :  { %1582 = vtanh.f32 %v592_v3  ;;  %v607_v8 = vadd.f32 %v1455_v4, %v2114_v42 }
 0x120   :  { %v1571_v7 = vpop.eup %1570  ;;  %1584 = vtanh.f32 %v597_v59  ;;  %v601_v48 = vpop.f32.mrf.mxu1 }
 0x121   :  { %v1573_v11 = vpop.eup %1572  ;;  %v602_v12 = vadd.f32 %v2114_v42, %v601_v48  ;;  %1505 = vmatprep.mubr.msk.f32.mxu0 %vm677_vm1, %v1571_v7 }
 0x122   :  { %v1458_v15 = vpop.f32.mrf.mxu1  ;;  %1506 = vmatmul.mubr.msk.f32.gmra.mxu0 %vm677_vm1, %v1573_v11 }
 0x123   :  { %1586 = vtanh.f32 %v602_v12  ;;  %v617_v19 = vadd.f32 %v1458_v15, %v2114_v42 }
 0x124   :  { %v1575_v16 = vpop.eup %1574  ;;  %1588 = vtanh.f32 %v607_v8  ;;  %v611_v20 = vpop.f32.mrf.mxu1 }
 0x125   :  { %v1577_v23 = vpop.eup %1576  ;;  %v612_v24 = vadd.f32 %v2114_v42, %v611_v20  ;;  %1508 = vmatprep.mubr.msk.f32.mxu0 %vm677_vm1, %v1575_v16 }
 0x126   :  { %v1461_v27 = vpop.f32.mrf.mxu1  ;;  %1509 = vmatmul.mubr.msk.f32.gmra.mxu0 %vm677_vm1, %v1577_v23 }
 0x127   :  { %1590 = vtanh.f32 %v612_v24  ;;  %v627_v31 = vadd.f32 %v1461_v27, %v2114_v42 }
 0x128   :  { %v1579_v28 = vpop.eup %1578  ;;  %1592 = vtanh.f32 %v617_v19  ;;  %v621_v32 = vpop.f32.mrf.mxu1 }
 0x129   :  { %v1581_v35 = vpop.eup %1580  ;;  %v622_v36 = vadd.f32 %v2114_v42, %v621_v32  ;;  %1511 = vmatprep.mubr.msk.f32.mxu0 %vm677_vm1, %v1579_v28 }
 0x12a   :  { %1512 = vmatmul.mubr.msk.f32.gmra.mxu0 %vm677_vm1, %v1581_v35 }
 0x12b   :  { %1594 = vtanh.f32 %v622_v36 }
 0x12c   :  { %v1583_v39 = vpop.eup %1582  ;;  %1596 = vtanh.f32 %v627_v31 }
 0x12d   :  { %v1585_v40 = vpop.eup %1584  ;;  %1514 = vmatprep.mubr.msk.f32.mxu0 %vm677_vm1, %v1583_v39 }
 0x12e   :  { %1515 = vmatmul.mubr.msk.f32.gmra.mxu0 %vm677_vm1, %v1585_v40 }
 0x130   :  { %v1587_v44 = vpop.eup %1586 }
 0x131   :  { %v1589_v45 = vpop.eup %1588  ;;  %1517 = vmatprep.mubr.msk.f32.mxu0 %vm677_vm1, %v1587_v44 }
 0x132   :  { %1518 = vmatmul.mubr.msk.f32.gmra.mxu0 %vm677_vm1, %v1589_v45 }
 0x134   :  { %v1591_v47 = vpop.eup %1590 }
 0x135   :  { %v1593_v42 = vpop.eup %1592  ;;  %1520 = vmatprep.mubr.msk.f32.mxu0 %vm677_vm1, %v1591_v47 }
 0x136   :  { %1521 = vmatmul.mubr.msk.f32.gmra.mxu0 %vm677_vm1, %v1593_v42 }
 0x138   :  { %v1595_v49 = vpop.eup %1594 }
 0x139   :  { %v1597_v51 = vpop.eup %1596  ;;  %1523 = vmatprep.mubr.msk.f32.mxu0 %vm677_vm1, %v1595_v49 }
 0x13a   :  { %1524 = vmatmul.mubr.msk.f32.gmra.mxu0 %vm677_vm1, %v1597_v51 }
 0x1be   :  { %v1480_v56 = vpop.f32.mrf.mxu0 }
 0x1bf   :  { %v846_v59 = vadd.f32 %v1480_v56, %v2225_v53 }
 0x1c0   :  { %v840_v63 = vpop.f32.mrf.mxu0 }
 0x1c1   :  { %v1000_v0 = vadd.f32 %v846_v59, %v1925_v58  ;;  %1064 = vst.msk [vmem:[%s2555_s8 + $0x8] sm:$0xff] %vm72_vm0, %v846_v59  ;;  %v841_v3 = vadd.f32 %v2225_v53, %v840_v63 }
 0x1c2   :  { %v1483_v4 = vpop.f32.mrf.mxu0 }
 0x1c3   :  { %1032 = vst.msk [vmem:[%s2556_s7 + $0x8] sm:$0xff] %vm72_vm0, %v1000_v0  ;;  %v999_v7 = vadd.f32 %v841_v3, %v1941_v62  ;;  %1063 = vst.msk [vmem:[%s2555_s8] sm:$0xff] %vm72_vm0, %v841_v3  ;;  %v856_v58 = vadd.f32 %v1483_v4, %v2225_v53 }
 0x1c4   :  { %v850_v8 = vpop.f32.mrf.mxu0 }
 0x1c5   :  { %1031 = vst.msk [vmem:[%s2556_s7] sm:$0xff] %vm72_vm0, %v999_v7  ;;  %v1002_v48 = vadd.f32 %v856_v58, %v1957_v2  ;;  %1066 = vst.msk [vmem:[%s2555_s8 + $0x18] sm:$0xff] %vm72_vm0, %v856_v58  ;;  %v851_v62 = vadd.f32 %v2225_v53, %v850_v8 }
 0x1c6   :  { %v1486_v11 = vpop.f32.mrf.mxu0 }
 0x1c7   :  { %1034 = vst.msk [vmem:[%s2556_s7 + $0x18] sm:$0xff] %vm72_vm0, %v1002_v48  ;;  %v1001_v12 = vadd.f32 %v851_v62, %v1973_v6  ;;  %1065 = vst.msk [vmem:[%s2555_s8 + $0x10] sm:$0xff] %vm72_vm0, %v851_v62  ;;  %v866_v2 = vadd.f32 %v1486_v11, %v2225_v53 }
 0x1c8   :  { %v860_v15 = vpop.f32.mrf.mxu0 }
 0x1c9   :  { %1033 = vst.msk [vmem:[%s2556_s7 + $0x10] sm:$0xff] %vm72_vm0, %v1001_v12  ;;  %v1004_v16 = vadd.f32 %v866_v2, %v1989_v10  ;;  %1068 = vst.msk [vmem:[%s2555_s8 + $0x28] sm:$0xff] %vm72_vm0, %v866_v2  ;;  %v861_v6 = vadd.f32 %v2225_v53, %v860_v15 }
 0x1ca   :  { %v1489_v19 = vpop.f32.mrf.mxu0 }
 0x1cb   :  { %1036 = vst.msk [vmem:[%s2556_s7 + $0x28] sm:$0xff] %vm72_vm0, %v1004_v16  ;;  %v1003_v20 = vadd.f32 %v861_v6, %v2005_v14  ;;  %1067 = vst.msk [vmem:[%s2555_s8 + $0x20] sm:$0xff] %vm72_vm0, %v861_v6  ;;  %v876_v10 = vadd.f32 %v1489_v19, %v2225_v53 }
 0x1cc   :  { %v870_v23 = vpop.f32.mrf.mxu0 }
 0x1cd   :  { %1035 = vst.msk [vmem:[%s2556_s7 + $0x20] sm:$0xff] %vm72_vm0, %v1003_v20  ;;  %v1006_v24 = vadd.f32 %v876_v10, %v2021_v18  ;;  %1070 = vst.msk [vmem:[%s2555_s8 + $0x38] sm:$0xff] %vm72_vm0, %v876_v10  ;;  %v871_v14 = vadd.f32 %v2225_v53, %v870_v23 }
 0x1ce   :  { %v1492_v27 = vpop.f32.mrf.mxu0 }
 0x1cf   :  { %1038 = vst.msk [vmem:[%s2556_s7 + $0x38] sm:$0xff] %vm72_vm0, %v1006_v24  ;;  %v1005_v28 = vadd.f32 %v871_v14, %v2037_v22  ;;  %1069 = vst.msk [vmem:[%s2555_s8 + $0x30] sm:$0xff] %vm72_vm0, %v871_v14  ;;  %v886_v18 = vadd.f32 %v1492_v27, %v2225_v53 }
 0x1d0   :  { %v880_v31 = vpop.f32.mrf.mxu0 }
 0x1d1   :  { %1037 = vst.msk [vmem:[%s2556_s7 + $0x30] sm:$0xff] %vm72_vm0, %v1005_v28  ;;  %v1008_v32 = vadd.f32 %v886_v18, %v2053_v26  ;;  %1072 = vst.msk [vmem:[%s2555_s8 + $0x48] sm:$0xff] %vm72_vm0, %v886_v18  ;;  %v881_v22 = vadd.f32 %v2225_v53, %v880_v31 }
 0x1d2   :  { %v1495_v35 = vpop.f32.mrf.mxu0 }
 0x1d3   :  { %1040 = vst.msk [vmem:[%s2556_s7 + $0x48] sm:$0xff] %vm72_vm0, %v1008_v32  ;;  %v1007_v36 = vadd.f32 %v881_v22, %v2069_v30  ;;  %1071 = vst.msk [vmem:[%s2555_s8 + $0x40] sm:$0xff] %vm72_vm0, %v881_v22  ;;  %v896_v26 = vadd.f32 %v1495_v35, %v2225_v53 }
 0x1d4   :  { %v890_v39 = vpop.f32.mrf.mxu0 }
 0x1d5   :  { %1039 = vst.msk [vmem:[%s2556_s7 + $0x40] sm:$0xff] %vm72_vm0, %v1007_v36  ;;  %v1010_v40 = vadd.f32 %v896_v26, %v2085_v34  ;;  %1074 = vst.msk [vmem:[%s2555_s8 + $0x58] sm:$0xff] %vm72_vm0, %v896_v26  ;;  %v891_v30 = vadd.f32 %v2225_v53, %v890_v39 }
 0x1d6   :  { %v1498_v44 = vpop.f32.mrf.mxu0 }
 0x1d7   :  { %1042 = vst.msk [vmem:[%s2556_s7 + $0x58] sm:$0xff] %vm72_vm0, %v1010_v40  ;;  %v1009_v45 = vadd.f32 %v891_v30, %v2101_v38  ;;  %1073 = vst.msk [vmem:[%s2555_s8 + $0x50] sm:$0xff] %vm72_vm0, %v891_v30  ;;  %v906_v34 = vadd.f32 %v1498_v44, %v2225_v53 }
 0x1d8   :  { %v900_v47 = vpop.f32.mrf.mxu0 }
 0x1d9   :  { %1041 = vst.msk [vmem:[%s2556_s7 + $0x50] sm:$0xff] %vm72_vm0, %v1009_v45  ;;  %v1012_v42 = vadd.f32 %v906_v34, %v2122_v43  ;;  %1076 = vst.msk [vmem:[%s2555_s8 + $0x68] sm:$0xff] %vm72_vm0, %v906_v34  ;;  %v901_v38 = vadd.f32 %v2225_v53, %v900_v47 }
 0x1da   :  { %v1501_v49 = vpop.f32.mrf.mxu0 }
 0x1db   :  { %1044 = vst.msk [vmem:[%s2556_s7 + $0x68] sm:$0xff] %vm72_vm0, %v1012_v42  ;;  %v1011_v51 = vadd.f32 %v901_v38, %v2135_v46  ;;  %1075 = vst.msk [vmem:[%s2555_s8 + $0x60] sm:$0xff] %vm72_vm0, %v901_v38  ;;  %v916_v43 = vadd.f32 %v1501_v49, %v2225_v53 }
 0x1dc   :  { %v910_v56 = vpop.f32.mrf.mxu0 }
 0x1dd   :  { %1043 = vst.msk [vmem:[%s2556_s7 + $0x60] sm:$0xff] %vm72_vm0, %v1011_v51  ;;  %v1014_v59 = vadd.f32 %v916_v43, %v2145_v55  ;;  %1078 = vst.msk [vmem:[%s2555_s8 + $0x78] sm:$0xff] %vm72_vm0, %v916_v43  ;;  %v911_v46 = vadd.f32 %v2225_v53, %v910_v56 }
 0x1de   :  { %v1504_v63 = vpop.f32.mrf.mxu0 }
 0x1df   :  { %1046 = vst.msk [vmem:[%s2556_s7 + $0x78] sm:$0xff] %vm72_vm0, %v1014_v59  ;;  %v1013_v0 = vadd.f32 %v911_v46, %v2153_v60  ;;  %1077 = vst.msk [vmem:[%s2555_s8 + $0x70] sm:$0xff] %vm72_vm0, %v911_v46  ;;  %v926_v55 = vadd.f32 %v1504_v63, %v2225_v53 }
 0x1e0   :  { %v920_v3 = vpop.f32.mrf.mxu0 }
 0x1e1   :  { %1045 = vst.msk [vmem:[%s2556_s7 + $0x70] sm:$0xff] %vm72_vm0, %v1013_v0  ;;  %v1016_v4 = vadd.f32 %v926_v55, %v1898_v50  ;;  %1080 = vst.msk [vmem:[%s2555_s8 + $0x88] sm:$0xff] %vm72_vm0, %v926_v55  ;;  %v921_v60 = vadd.f32 %v2225_v53, %v920_v3 }
 0x1e2   :  { %v1507_v7 = vpop.f32.mrf.mxu0 }
 0x1e3   :  { %1048 = vst.msk [vmem:[%s2556_s7 + $0x88] sm:$0xff] %vm72_vm0, %v1016_v4  ;;  %v1015_v58 = vadd.f32 %v921_v60, %v1906_v52  ;;  %1079 = vst.msk [vmem:[%s2555_s8 + $0x80] sm:$0xff] %vm72_vm0, %v921_v60  ;;  %v936_v50 = vadd.f32 %v1507_v7, %v2225_v53 }
 0x1e4   :  { %v930_v8 = vpop.f32.mrf.mxu0 }
 0x1e5   :  { %1047 = vst.msk [vmem:[%s2556_s7 + $0x80] sm:$0xff] %vm72_vm0, %v1015_v58  ;;  %v1018_v48 = vadd.f32 %v936_v50, %v1914_v54  ;;  %1082 = vst.msk [vmem:[%s2555_s8 + $0x98] sm:$0xff] %vm72_vm0, %v936_v50  ;;  %v931_v52 = vadd.f32 %v2225_v53, %v930_v8 }
 0x1e6   :  { %v1510_v62 = vpop.f32.mrf.mxu0 }
 0x1e7   :  { %1050 = vst.msk [vmem:[%s2556_s7 + $0x98] sm:$0xff] %vm72_vm0, %v1018_v48  ;;  %v1017_v11 = vadd.f32 %v931_v52, %v1922_v57  ;;  %1081 = vst.msk [vmem:[%s2555_s8 + $0x90] sm:$0xff] %vm72_vm0, %v931_v52  ;;  %v946_v54 = vadd.f32 %v1510_v62, %v2225_v53 }
 0x1e8   :  { %v940_v12 = vpop.f32.mrf.mxu0 }
 0x1e9   :  { %1049 = vst.msk [vmem:[%s2556_s7 + $0x90] sm:$0xff] %vm72_vm0, %v1017_v11  ;;  %v1020_v2 = vadd.f32 %v946_v54, %v1933_v61  ;;  %1084 = vst.msk [vmem:[%s2555_s8 + $0xa8] sm:$0xff] %vm72_vm0, %v946_v54  ;;  %v941_v57 = vadd.f32 %v2225_v53, %v940_v12 }
 0x1ea   :  { %v1513_v15 = vpop.f32.mrf.mxu0 }
 0x1eb   :  { %1052 = vst.msk [vmem:[%s2556_s7 + $0xa8] sm:$0xff] %vm72_vm0, %v1020_v2  ;;  %v1019_v16 = vadd.f32 %v941_v57, %v1949_v1  ;;  %1083 = vst.msk [vmem:[%s2555_s8 + $0xa0] sm:$0xff] %vm72_vm0, %v941_v57  ;;  %v956_v61 = vadd.f32 %v1513_v15, %v2225_v53 }
 0x1ec   :  { %v950_v6 = vpop.f32.mrf.mxu0 }
 0x1ed   :  { %1051 = vst.msk [vmem:[%s2556_s7 + $0xa0] sm:$0xff] %vm72_vm0, %v1019_v16  ;;  %v1022_v19 = vadd.f32 %v956_v61, %v1965_v5  ;;  %1086 = vst.msk [vmem:[%s2555_s8 + $0xb8] sm:$0xff] %vm72_vm0, %v956_v61  ;;  %v951_v1 = vadd.f32 %v2225_v53, %v950_v6 }
 0x1ee   :  { %v1516_v20 = vpop.f32.mrf.mxu0 }
 0x1ef   :  { %1054 = vst.msk [vmem:[%s2556_s7 + $0xb8] sm:$0xff] %vm72_vm0, %v1022_v19  ;;  %v1021_v10 = vadd.f32 %v951_v1, %v1981_v9  ;;  %1085 = vst.msk [vmem:[%s2555_s8 + $0xb0] sm:$0xff] %vm72_vm0, %v951_v1  ;;  %v966_v5 = vadd.f32 %v1516_v20, %v2225_v53 }
 0x1f0   :  { %v960_v23 = vpop.f32.mrf.mxu0 }
 0x1f1   :  { %1053 = vst.msk [vmem:[%s2556_s7 + $0xb0] sm:$0xff] %vm72_vm0, %v1021_v10  ;;  %v1024_v24 = vadd.f32 %v966_v5, %v1997_v13  ;;  %1088 = vst.msk [vmem:[%s2555_s8 + $0xc8] sm:$0xff] %vm72_vm0, %v966_v5  ;;  %v961_v9 = vadd.f32 %v2225_v53, %v960_v23 }
 0x1f2   :  { %v1519_v14 = vpop.f32.mrf.mxu0 }
 0x1f3   :  { %1056 = vst.msk [vmem:[%s2556_s7 + $0xc8] sm:$0xff] %vm72_vm0, %v1024_v24  ;;  %v1023_v27 = vadd.f32 %v961_v9, %v2013_v17  ;;  %1087 = vst.msk [vmem:[%s2555_s8 + $0xc0] sm:$0xff] %vm72_vm0, %v961_v9  ;;  %v976_v13 = vadd.f32 %v1519_v14, %v2225_v53 }
 0x1f4   :  { %v970_v28 = vpop.f32.mrf.mxu0 }
 0x1f5   :  { %1055 = vst.msk [vmem:[%s2556_s7 + $0xc0] sm:$0xff] %vm72_vm0, %v1023_v27  ;;  %v1026_v18 = vadd.f32 %v976_v13, %v2029_v21  ;;  %1090 = vst.msk [vmem:[%s2555_s8 + $0xd8] sm:$0xff] %vm72_vm0, %v976_v13  ;;  %v971_v17 = vadd.f32 %v2225_v53, %v970_v28 }
 0x1f6   :  { %v1522_v31 = vpop.f32.mrf.mxu0 }
 0x1f7   :  { %1058 = vst.msk [vmem:[%s2556_s7 + $0xd8] sm:$0xff] %vm72_vm0, %v1026_v18  ;;  %v1025_v32 = vadd.f32 %v971_v17, %v2045_v25  ;;  %1089 = vst.msk [vmem:[%s2555_s8 + $0xd0] sm:$0xff] %vm72_vm0, %v971_v17  ;;  %v986_v21 = vadd.f32 %v1522_v31, %v2225_v53 }
 0x1f8   :  { %v980_v22 = vpop.f32.mrf.mxu0 }
 0x1f9   :  { %1057 = vst.msk [vmem:[%s2556_s7 + $0xd0] sm:$0xff] %vm72_vm0, %v1025_v32  ;;  %v1028_v35 = vadd.f32 %v986_v21, %v2061_v29  ;;  %1092 = vst.msk [vmem:[%s2555_s8 + $0xe8] sm:$0xff] %vm72_vm0, %v986_v21  ;;  %v981_v25 = vadd.f32 %v2225_v53, %v980_v22 }
 0x1fa   :  { %v1525_v36 = vpop.f32.mrf.mxu0 }
 0x1fb   :  { %1060 = vst.msk [vmem:[%s2556_s7 + $0xe8] sm:$0xff] %vm72_vm0, %v1028_v35  ;;  %v1027_v26 = vadd.f32 %v981_v25, %v2077_v33  ;;  %1091 = vst.msk [vmem:[%s2555_s8 + $0xe0] sm:$0xff] %vm72_vm0, %v981_v25  ;;  %v996_v29 = vadd.f32 %v1525_v36, %v2225_v53 }
 0x1fc   :  { %v990_v39 = vpop.f32.mrf.mxu0 }
 0x1fd   :  { %1059 = vst.msk [vmem:[%s2556_s7 + $0xe0] sm:$0xff] %vm72_vm0, %v1027_v26  ;;  %v1030_v40 = vadd.f32 %v996_v29, %v2093_v37  ;;  %1094 = vst.msk [vmem:[%s2555_s8 + $0xf8] sm:$0xff] %vm72_vm0, %v996_v29  ;;  %v991_v33 = vadd.f32 %v2225_v53, %v990_v39 }
 0x1ff   :  { %1062 = vst.msk [vmem:[%s2556_s7 + $0xf8] sm:$0xff] %vm72_vm0, %v1030_v40  ;;  %v1029_v30 = vadd.f32 %v991_v33, %v2109_v41  ;;  %1093 = vst.msk [vmem:[%s2555_s8 + $0xf0] sm:$0xff] %vm72_vm0, %v991_v33 }
 0x201   :  { %1061 = vst.msk [vmem:[%s2556_s7 + $0xf0] sm:$0xff] %vm72_vm0, %v1029_v30 }

</bundles_post_ra>
